<compile_context>
chip_gen: v7x
topology: tpu7x:2x2x1
jax: 0.10.0
libtpu: 0.0.40
codegen_flags: <defaults>
</compile_context>

<pallas_src>
import functools

import jax
import jax.numpy as jnp
from jax.experimental import pallas as pl
from jax.experimental.pallas import tpu as pltpu

F32 = jnp.float32
BF16 = jnp.bfloat16
VMEM = pl.BlockSpec(memory_space=pltpu.MemorySpace.VMEM)

BN_EPS = 1e-5
# eval-mode BatchNorm1d with running_mean=0, running_var=1, gamma=1, beta=0
BN_SCALE = float(1.0 / (1.0 + BN_EPS) ** 0.5)

LANE = 128
SUB = 8


def _rup(x, m):
    return ((x + m - 1) // m) * m


# ---------------------------------------------------------------------------
# Fused Pallas kernel: whole forward pass
# ---------------------------------------------------------------------------
def _fused_forward_kernel(ahat_ref, amean_ref, dout_ref, din_ref, gmask_ref,
                          nmask_ref, batch_ref, x0_ref, wpre_ref, bpre_ref,
                          wcat_ref, bcat_ref,
                          w1_ref, b1_ref, w2_ref, b2_ref,
                          w3_ref, b3_ref, w4_ref, b4_ref,
                          out_ref, de_ref):
    hp = wpre_ref.shape[1]                     # padded hidden width (128)
    ahat = ahat_ref[...]                       # bf16 [Np, Np] GCN-normalized Â
    amean = amean_ref[...]                     # bf16 [Np, Np] row-normalized out-adjacency
    gmask = gmask_ref[...]                     # f32  [Np, 1]  (out-degree > 0)
    nmask = nmask_ref[...]                     # f32  [Np, 1]  valid (non-padded) node rows

    # --- preLinear + ReLU (init_drop dropout: eval mode -> identity) ---------
    # Padded rows are explicitly zeroed so they can never pick up relu(b_pre).
    x = jnp.maximum(
        jnp.dot(x0_ref[...], wpre_ref[...], preferred_element_type=F32)
        + bpre_ref[...], 0.0) * nmask

    depth = wcat_ref.shape[0]

    # --- G2-gated GCN layers, x stays resident in VMEM -----------------------
    def layer(d, x):
        # fused conv / conv_gg: one x@[W1|W2] then one ahat@[XW1|XW2] (bf16 MXU)
        xw = jnp.dot(x.astype(BF16), wcat_ref[d], preferred_element_type=F32)
        s = jnp.dot(ahat, xw.astype(BF16), preferred_element_type=F32) + bcat_ref[d]
        s = jnp.maximum(s, 0.0)
        xc = s[:, :hp]                         # relu(GCNConv(x))
        xg = s[:, hp:]                         # relu(conv_gg(x))
        # G2 gate (elementwise expansion kept in f32):
        #   tau_i = tanh(mean_{j in N_out(i)} (xg_i - xg_j)^2)
        #         = tanh(xg_i^2 - 2*xg_i*m1_i + m2_i),  m1/m2 = out-neighbor means
        g = jnp.concatenate([xg, xg * xg], axis=1).astype(BF16)   # [Np, 2*Hp]
        m = jnp.dot(amean, g, preferred_element_type=F32)          # one gate matmul
        m1 = m[:, :hp]
        m2 = m[:, hp:]
        arg = jnp.maximum(xg * xg - 2.0 * xg * m1 + m2, 0.0)   # mean of squares >= 0
        tau = jnp.tanh(gmask * arg)
        return (1.0 - tau) * x + tau * xc

    x = jax.lax.fori_loop(0, depth, layer, x, unroll=True)

    # --- readout='add' global add-pool, built in-kernel from batch vector ----
    gp = out_ref.shape[0]
    npad = batch_ref.shape[1]
    gids = jax.lax.broadcasted_iota(jnp.int32, (gp, npad), 0)
    pool = (gids == batch_ref[...]).astype(BF16)                  # [Gp, Np] exact 0/1
    h = jnp.dot(pool, x.astype(BF16), preferred_element_type=F32)  # [Gp, Hp]

    # --- MLP head (BN folded into bf16 W + f32 b; dropouts = identity) -------
    def head(v, w_ref, b_ref, relu):
        y = jnp.dot(v.astype(BF16), w_ref[...], preferred_element_type=F32) + b_ref[...]
        return jnp.maximum(y, 0.0) if relu else y

    o = head(h, w1_ref, b1_ref, True)    # lin1 + BN + relu
    o = head(o, w2_ref, b2_ref, True)    # lin2 + BN + relu
    o = head(o, w3_ref, b3_ref, True)    # lin3a + BN + relu
    o = head(o, w4_ref, b4_ref, False)   # lin4a
    out_ref[...] = o

    # --- Dirichlet energy; A@x via amean@x, dout folded into scalar cross ----
    ax0 = jnp.dot(amean, x.astype(BF16), preferred_element_type=F32)
    rowsq = jnp.sum(x * x, axis=1, keepdims=True)
    cross0 = jnp.sum(x * ax0, axis=1, keepdims=True)
    per_node = (dout_ref[...] + din_ref[...]) * rowsq - 2.0 * dout_ref[...] * cross0
    de_ref[...] = 0.5 * jnp.sum(per_node, axis=0, keepdims=True)


# ---------------------------------------------------------------------------
# Parameters
# ---------------------------------------------------------------------------
def init_params(key, dim_in, dim_h, depth):
    ks = jax.random.split(key, 8 + 2 * depth)

    def lin(k, fin, fout):
        lim = 1.0 / (fin ** 0.5)
        kw, kb = jax.random.split(k)
        w = jax.random.uniform(kw, (fin, fout), F32, -lim, lim)
        b = jax.random.uniform(kb, (fout,), F32, -lim, lim)
        return w, b

    params = {
        "pre": [lin(ks[0], dim_in, dim_h)],    # prelinear=1 (module default)
        "gcn": [],
        "gg": [],
        "lin1": lin(ks[1], dim_h, dim_h),
        "lin2": lin(ks[2], dim_h, dim_h),
        "lin3a": lin(ks[3], dim_h, dim_h),
        "lin4a": lin(ks[4], dim_h, 1),
    }
    for d in range(depth):
        w1, _ = lin(ks[8 + d], dim_h, dim_h)
        w2, _ = lin(ks[8 + depth + d], dim_h, dim_h)
        params["gcn"].append((w1, jnp.zeros((dim_h,), F32)))  # GCNConv bias: zeros
        params["gg"].append((w2, jnp.zeros((dim_h,), F32)))
    return params


# ---------------------------------------------------------------------------
# Graph preprocessing (hoisted; cache its result when the graph is static)
# ---------------------------------------------------------------------------
@functools.partial(jax.jit, static_argnames=("n",))
def prepare_graph(edge_index, batch, n):
    src, dst = edge_index[0], edge_index[1]
    np_pad = _rup(max(n, SUB), SUB)

    # GCN-normalized adjacency with self-loops: Â[dst, src] = 1/sqrt(d_dst*d_src)
    deg = jnp.zeros((n,), F32).at[dst].add(1.0) + 1.0
    dinv = 1.0 / jnp.sqrt(deg)
    ahat = jnp.zeros((n, n), F32).at[dst, src].add(dinv[dst] * dinv[src])
    ahat = ahat + jnp.diag(dinv * dinv)

    # Row-normalized out-adjacency for the G2 scatter-mean gate (no self-loops)
    dout = jnp.zeros((n,), F32).at[src].add(1.0)
    din = jnp.zeros((n,), F32).at[dst].add(1.0)
    amean = jnp.zeros((n, n), F32).at[src, dst].add(1.0) / jnp.maximum(dout, 1.0)[:, None]
    gmask = (dout > 0).astype(F32)

    # Lane/sublane-padded operands (zero pad; padded nodes masked out in-kernel)
    ahat_p = jnp.zeros((np_pad, np_pad), F32).at[:n, :n].set(ahat).astype(BF16)
    amean_p = jnp.zeros((np_pad, np_pad), F32).at[:n, :n].set(amean).astype(BF16)
    dout_p = jnp.zeros((np_pad, 1), F32).at[:n, 0].set(dout)
    din_p = jnp.zeros((np_pad, 1), F32).at[:n, 0].set(din)
    gmask_p = jnp.zeros((np_pad, 1), F32).at[:n, 0].set(gmask)
    nmask_p = jnp.zeros((np_pad, 1), F32).at[:n, 0].set(1.0)
    batch_p = jnp.full((1, np_pad), -1, jnp.int32).at[0, :n].set(batch.astype(jnp.int32))
    return (ahat_p, amean_p, dout_p, din_p, gmask_p, nmask_p, batch_p)


# ---------------------------------------------------------------------------
# Forward
# ---------------------------------------------------------------------------
@functools.partial(jax.jit, static_argnames=("num_graphs",))
def to_gnn_forward(params, x, graph, num_graphs):
    n, fin = x.shape
    dim_h = params["lin1"][0].shape[0]
    (ahat_p, amean_p, dout_p, din_p, gmask_p, nmask_p, batch_p) = graph
    np_pad = ahat_p.shape[0]
    hp = _rup(dim_h, LANE)
    fp = _rup(max(fin, 1), LANE)
    gp = _rup(max(num_graphs, SUB), SUB)
    op = LANE                                  # padded width of scalar output

    # bf16 node features on the wire (f32 accumulation on the MXU)
    x0_p = jnp.zeros((np_pad, fp), F32).at[:n, :fin].set(x.astype(F32)).astype(BF16)

    def pad_w(w, r, c):
        return jnp.zeros((r, c), F32).at[: w.shape[0], : w.shape[1]].set(w)

    def pad_b(b, c):
        return jnp.zeros((1, c), F32).at[0, : b.shape[0]].set(b)

    wpre, bpre = params["pre"][0]
    wpre_p = pad_w(wpre, fp, hp).astype(BF16)
    bpre_p = pad_b(bpre, hp)

    # Stacked, concatenated layer weights: [depth, Hp, 2*Hp] / [depth, 1, 2*Hp]
    # TODO(synk): dim_h=32 under-fills the 128-lane tiles 4x; a single-slab
    # [Hp,128] packing would halve layer-matmul width but only pays off once
    # the layer matmuls (not DMA/launch) dominate, which they don't at N=16.
    wcat = jnp.stack([
        jnp.concatenate([pad_w(w1, hp, hp), pad_w(w2, hp, hp)], axis=1)
        for (w1, _), (w2, _) in zip(params["gcn"], params["gg"])
    ]).astype(BF16)
    bcat = jnp.stack([
        jnp.concatenate([pad_b(b1, hp), pad_b(b2, hp)], axis=1)
        for (_, b1), (_, b2) in zip(params["gcn"], params["gg"])
    ])

    # eval-mode BatchNorm1d folded into head weights (scale = 1/sqrt(1+eps));
    # weights shipped in bf16, biases kept f32.
    w1h = pad_w(params["lin1"][0] * BN_SCALE, hp, hp).astype(BF16)
    b1h = pad_b(params["lin1"][1] * BN_SCALE, hp)
    w2h = pad_w(params["lin2"][0] * BN_SCALE, hp, hp).astype(BF16)
    b2h = pad_b(params["lin2"][1] * BN_SCALE, hp)
    w3h = pad_w(params["lin3a"][0] * BN_SCALE, hp, hp).astype(BF16)
    b3h = pad_b(params["lin3a"][1] * BN_SCALE, hp)
    w4h = pad_w(params["lin4a"][0], hp, op).astype(BF16)
    b4h = pad_b(params["lin4a"][1], op)

    args = (ahat_p, amean_p, dout_p, din_p, gmask_p, nmask_p, batch_p, x0_p,
            wpre_p, bpre_p, wcat, bcat,
            w1h, b1h, w2h, b2h, w3h, b3h, w4h, b4h)

    # Generation-aware VMEM budget: inputs + outputs + per-layer f32 temps
    # (xw/s/g/m ≈ 4 * Np * 2Hp) + resident x / residual copies, capped at ~75%
    # of this chip's physical VMEM. No 2x factor: gridless call, no double-buffer.
    depth = wcat.shape[0]
    need = sum(int(a.size) * a.dtype.itemsize for a in args)
    need += (gp * op + SUB * LANE) * 4                      # outputs (padded)
    need += 4 * np_pad * (2 * hp) * 4                       # per-layer temps
    need += 3 * np_pad * hp * 4                             # x + residual temps
    need += gp * np_pad * 4                                 # pool one-hot
    try:
        cap = int(0.75 * pltpu.get_tpu_info().vmem_capacity_bytes)
    except Exception:                                       # pragma: no cover
        cap = 48 << 20
    vmem_limit = int(min(max(need + (2 << 20), 4 << 20), cap))

    out_p, de = pl.pallas_call(
        _fused_forward_kernel,
        out_shape=(jax.ShapeDtypeStruct((gp, op), F32),
                   jax.ShapeDtypeStruct((1, 1), F32)),
        in_specs=[VMEM] * len(args),
        out_specs=(VMEM, VMEM),
        compiler_params=pltpu.CompilerParams(vmem_limit_bytes=vmem_limit),
    )(*args)

    # TODO(synk): fast_extract_control_nodes_features is not defined in the
    # source; with ctrl=False we use the module's readout='add' global add pool.
    # TODO(synk): dirichlet_energy is not defined in the reference source; we use
    # E = 0.5 * sum_{(u,v) in E} ||x_u - x_v||^2 (dense-A formulation).
    out = out_p[:num_graphs, :1]
    return out, out, de[0, 0]


def to_gnn_apply(params, x, edge_index, batch, num_graphs):
    """Convenience: build graph operands then run the fused kernel.

    For repeated calls on a static graph, call prepare_graph once, keep the
    result, and call to_gnn_forward directly (avoids the O(N^2) host scatter
    preprocessing per call)."""
    graph = prepare_graph(edge_index, batch, int(x.shape[0]))
    return to_gnn_forward(params, x, graph, num_graphs)


if __name__ == "__main__":
    N, DIM_IN, DIM_H, DEPTH = 16, 4, 32, 2

    key = jax.random.PRNGKey(0)
    kx, kp = jax.random.split(key)
    x = jax.random.normal(kx, (N, DIM_IN), F32)

    # undirected ring graph (both directions of every edge)
    idx = jnp.arange(N)
    src = jnp.concatenate([idx, (idx + 1) % N])
    dst = jnp.concatenate([(idx + 1) % N, idx])
    edge_index = jnp.stack([src, dst]).astype(jnp.int32)   # [2, 32]
    batch = jnp.zeros((N,), jnp.int32)                      # single graph

    params = init_params(kp, DIM_IN, DIM_H, DEPTH)

    # Graph structure built once (cacheable), then the fused kernel.
    graph = prepare_graph(edge_index, batch, N)
    out1, out2, de = to_gnn_forward(params, x, graph, num_graphs=1)
    jax.block_until_ready((out1, out2, de))

    assert out1.shape == (1, 1) and out2.shape == (1, 1)
    print("KERNEL_OK")
</pallas_src>

<mosaic_0001>
module attributes {stable_mosaic.version = 11 : i64} {
  func.func private @main(%arg0: i32) attributes {dimension_semantics = [#tpu.dimension_semantics<core_parallel>], iteration_bounds = array<i64: 2>, tpu.core_type = #tpu.core_type<sc_scalar_subcore>, window_params = []} {
    return
  }
}

module attributes {stable_mosaic.version = 11 : i64} {
  func.func private @main(%arg0: i32) attributes {dimension_semantics = [#tpu.dimension_semantics<core_parallel>], iteration_bounds = array<i64: 2>, tpu.core_type = #tpu.core_type<sc_scalar_subcore>, window_params = []} {
    return
  }
}

</mosaic_0001>

<bundles_post_ra>
// kernel: mul.2
= control target key start
LH: loop header
LB: loop body
LE: loop exit
PB: predicated region body
PF: predicated region fallthrough
CT: control target
= control target key end

     0   :  { %s34_s0 = inlined_call_operand.vmem [shape: f32[32], index: 0, kind: input, shape index: {}]   ;;  %s35_s1 = inlined_call_operand.vmem [shape: f32[32], index: 1, kind: input, shape index: {}]   ;;  %s36_s2 = inlined_call_operand.vmem [shape: f32[32], index: 2, kind: output, shape index: {}]  }
   0x1   :  { %v3_v0 = vld [vmem:[%s34_s0] sm:$0x1] }
   0x2   :  { %v4_v1 = vld [vmem:[%s35_s1] sm:$0x1] }
   0x3   :  { %v7_v2 = vmul.f32 %v4_v1, %v3_v0 }
   0x5   :  { %9 = vst [vmem:[%s36_s2] sm:$0x1] %v7_v2 }

</bundles_post_ra>
